<compile_context>
chip_gen: v7x
topology: tpu7x:2x2x1
jax: 0.10.0
libtpu: 0.0.40
codegen_flags: <defaults>
</compile_context>

<pallas_src>
import functools

import jax
import jax.numpy as jnp
import numpy as np
from jax.experimental import pallas as pl
from jax.experimental.pallas import tpu as pltpu


def _round_up(x, m):
    return (x + m - 1) // m * m


def cnn_kernel(x_ref, w_ref, c_ref, out_ref, *, bb, s, r_mask):
    """One batch-block: fused conv(both branches, all taps) + ReLU + max + fc + sigmoid.

    x_ref  : (bb*s, fs_max*E_pad) bf16   im2col rows (row = (batch, time))
    w_ref  : (fs_max*E_pad, N_pad) bf16  fused per-tap conv weights, both branches
    c_ref  : (r_mask+8, N_pad) f32       rows [0,s): time/branch 0-1 mask
                                         row r_mask  : conv bias
                                         row r_mask+1: de-interleaved fc weights
                                         row r_mask+2: fc bias (lane 0)
    out_ref: (bb, 128) f32               sigmoid(logit) broadcast across lanes
    """
    # Single MXU matmul covers every tap of both conv branches (f32 accumulate).
    p = jnp.dot(x_ref[...], w_ref[...], preferred_element_type=jnp.float32)

    # Constants (all row offsets are multiples of 8 -> clean sublane slices).
    tail = c_ref[r_mask:r_mask + 8, :]          # (8, N_pad)
    bias = tail[0:1, :]                         # conv bias
    fcw = tail[1:2, :]                          # fc weights (de-interleaved)
    fcb = tail[2:3, 0:1]                        # fc bias scalar as (1,1)

    p = p + bias
    n = p.shape[-1]
    p3 = p.reshape(bb, s, n)                    # (batch, time, filt)

    # Precomputed mask zeroes (i) time rows past each branch's valid length and
    # (ii) the padded filter lanes.  ReLU output is >= 0, so a 0-fill preserves
    # the max-over-time for valid columns.
    mask = c_ref[0:s, :]                        # (s, N_pad), broadcasts over bb
    act = jnp.maximum(p3, 0.0) * mask
    h = jnp.max(act, axis=1)                    # (bb, n) max-over-time

    # Fused fc: padded lanes carry fcw == 0, so a lane-reduce gives the logit.
    logit = jnp.sum(h * fcw, axis=1, keepdims=True) + fcb
    out_ref[...] = jnp.broadcast_to(jax.nn.sigmoid(logit), out_ref.shape)


def cnn_forward(tokens, vocab_vec, w1, b1, w2, b2, fc_w, fc_b):
    S, B = tokens.shape
    E = vocab_vec.shape[1]
    F = w1.shape[0]
    fs1, fs2 = w1.shape[2], w2.shape[2]
    fs_max = max(fs1, fs2)
    T1, T2 = S - fs1 + 1, S - fs2 + 1
    assert T1 > 0 and T2 > 0, "sequence shorter than a conv filter"
    assert fc_w.shape[1] == 2 * F, "module implies embedding_dim == 2*n_filters"

    E_pad = _round_up(E, 128)           # lane-pad embedding dim
    N_pad = _round_up(2 * F, 128)       # BOTH branches packed in one lane block
    K = fs_max * E_pad                  # fused contraction dim
    BB = 16                             # batch elems / step -> M = BB*S = 256
    B_pad = _round_up(B, BB)
    r_mask = _round_up(S, 8)            # 8-aligned row offset for the constants

    # ---- plain-JAX layout plumbing (gather + im2col + zero padding, no math) ----
    emb = jnp.transpose(vocab_vec[tokens], (1, 0, 2)).astype(jnp.float32)  # (B,S,E)
    emb = jnp.pad(emb, ((0, B_pad - B), (0, fs_max - 1), (0, E_pad - E)))
    # x_col[b, t, k*E_pad + e] = emb[b, t+k, e]  (zero where t+k >= S)
    x_col = jnp.concatenate([emb[:, k:k + S, :] for k in range(fs_max)], axis=-1)
    x_col = x_col.reshape(B_pad * S, K).astype(jnp.bfloat16)

    # Fused conv weights: tap-k rows at [k*E_pad, k*E_pad+E); branch1 filters in
    # columns [0, F), branch2 in [F, 2F); everything else zero.
    w1_t = jnp.transpose(w1[:, 0], (1, 2, 0)).astype(jnp.float32)   # (fs1, E, F)
    w2_t = jnp.transpose(w2[:, 0], (1, 2, 0)).astype(jnp.float32)   # (fs2, E, F)
    W = jnp.zeros((fs_max, E_pad, N_pad), jnp.float32)
    W = W.at[:fs1, :E, 0:F].set(w1_t)
    W = W.at[:fs2, :E, F:2 * F].set(w2_t)
    W = W.reshape(K, N_pad).astype(jnp.bfloat16)

    # Single constants block: mask rows | conv bias | fc weights | fc bias.
    t_idx = jnp.arange(r_mask)[:, None]
    c_idx = jnp.arange(N_pad)[None, :]
    t_lim = jnp.where(c_idx < F, T1, jnp.where(c_idx < 2 * F, T2, 0))
    mask = (t_idx < t_lim).astype(jnp.float32)                      # (r_mask, N_pad)

    bias_row = (jnp.zeros((N_pad,), jnp.float32)
                .at[0:F].set(b1.astype(jnp.float32))
                .at[F:2 * F].set(b2.astype(jnp.float32)))

    # Linear(2F, 1) applied to stack((x1, x2), dim=2).reshape(B, 2F):
    # interleaved [x1_0, x2_0, x1_1, x2_1, ...] -> de-interleave even/odd weights.
    fcw_flat = fc_w.reshape(-1).astype(jnp.float32)
    fcw_row = (jnp.zeros((N_pad,), jnp.float32)
               .at[0:F].set(fcw_flat[0::2])
               .at[F:2 * F].set(fcw_flat[1::2]))

    fcb_row = jnp.zeros((N_pad,), jnp.float32).at[0].set(
        fc_b.reshape(-1)[0].astype(jnp.float32))

    consts = jnp.zeros((r_mask + 8, N_pad), jnp.float32)
    consts = consts.at[0:r_mask, :].set(mask)
    consts = consts.at[r_mask, :].set(bias_row)
    consts = consts.at[r_mask + 1, :].set(fcw_row)
    consts = consts.at[r_mask + 2, :].set(fcb_row)

    kernel = functools.partial(cnn_kernel, bb=BB, s=S, r_mask=r_mask)

    out = pl.pallas_call(
        kernel,
        out_shape=jax.ShapeDtypeStruct((B_pad, 128), jnp.float32),
        grid_spec=pltpu.PrefetchScalarGridSpec(
            num_scalar_prefetch=0,
            grid=(B_pad // BB,),
            in_specs=[
                pl.BlockSpec((BB * S, K), lambda i: (i, 0)),           # im2col rows
                pl.BlockSpec((K, N_pad), lambda i: (0, 0)),            # fused conv W
                pl.BlockSpec((r_mask + 8, N_pad), lambda i: (0, 0)),   # constants
            ],
            out_specs=pl.BlockSpec((BB, 128), lambda i: (i, 0)),
        ),
        compiler_params=pltpu.CompilerParams(
            dimension_semantics=("parallel",)),
    )(x_col, W, consts)

    return out[:B, 0]


def cnn_reference(tokens, vocab_vec, w1, b1, w2, b2, fc_w, fc_b):
    """Pure-JAX (f32) re-statement of the PyTorch forward, for verification."""
    emb = vocab_vec[tokens]                         # (S, B, E)
    emb = jnp.transpose(emb, (1, 0, 2))             # (B, S, E)
    B, S, E = emb.shape
    F = w1.shape[0]

    def branch(w, b):
        fs = w.shape[2]
        T = S - fs + 1
        windows = jnp.stack([emb[:, k:k + T, :] for k in range(fs)], axis=2)  # (B,T,fs,E)
        out = jnp.einsum('btke,fke->bft', windows, w[:, 0]) + b[None, :, None]
        return jnp.max(jax.nn.relu(out), axis=2)    # (B, F)

    x1 = branch(w1, b1)
    x2 = branch(w2, b2)
    x = jnp.stack([x1, x2], axis=2).reshape(B, 2 * F)
    logits = x @ fc_w.T + fc_b                      # (B, 1)
    return jax.nn.sigmoid(logits[:, 0])


if __name__ == "__main__":
    # Module constraints: reshape(..., 100) and Linear(embedding_dim, 1) imply
    # embedding_dim == 2 * n_filters == 100.
    E, F = 100, 50
    filter_sizes = (3, 4)
    vocab_size = 50
    S, B = 16, 2                                    # seq_len, batch

    key = jax.random.PRNGKey(0)
    ks = jax.random.split(key, 8)
    vocab_vec = jax.random.normal(ks[0], (vocab_size, E), jnp.float32)
    w1 = jax.random.normal(ks[1], (F, 1, filter_sizes[0], E), jnp.float32) * 0.1
    b1 = jax.random.normal(ks[2], (F,), jnp.float32) * 0.1
    w2 = jax.random.normal(ks[3], (F, 1, filter_sizes[1], E), jnp.float32) * 0.1
    b2 = jax.random.normal(ks[4], (F,), jnp.float32) * 0.1
    fc_w = jax.random.normal(ks[5], (1, E), jnp.float32) * 0.1
    fc_b = jax.random.normal(ks[6], (1,), jnp.float32) * 0.1
    tokens = jax.random.randint(ks[7], (S, B), 0, vocab_size)   # (seq_len, batch)

    out = jax.jit(cnn_forward)(tokens, vocab_vec, w1, b1, w2, b2, fc_w, fc_b)
    out = jax.block_until_ready(out)

    ref = cnn_reference(tokens, vocab_vec, w1, b1, w2, b2, fc_w, fc_b)
    np.testing.assert_allclose(np.asarray(out), np.asarray(ref), atol=1e-2, rtol=1e-2)

    print("KERNEL_OK")
</pallas_src>

<mosaic_0001>
module attributes {stable_mosaic.version = 11 : i64} {
  func.func @cnn_kernel(%arg0: i32, %arg1: memref<256x512xbf16, #tpu.memory_space<vmem>>, %arg2: memref<512x128xbf16, #tpu.memory_space<vmem>>, %arg3: memref<24x128xf32, #tpu.memory_space<vmem>>, %arg4: memref<16x128xf32, #tpu.memory_space<vmem>>) attributes {dimension_semantics = [#tpu.dimension_semantics<parallel>], iteration_bounds = array<i64: 1>, scalar_prefetch = 0 : i64, scratch_operands = 0 : i64, tpu.core_type = #tpu.core_type<tc>, window_params = [{transform_indices = @transform_0, window_bounds = array<i64: 256, 512>}, {pipeline_mode = #tpu.pipeline_mode<synchronous>, transform_indices = @transform_1, window_bounds = array<i64: 512, 128>}, {pipeline_mode = #tpu.pipeline_mode<synchronous>, transform_indices = @transform_2, window_bounds = array<i64: 24, 128>}, {transform_indices = @transform_3, window_bounds = array<i64: 16, 128>}]} {
    %c0 = arith.constant 0 : index
    %c0_0 = arith.constant 0 : index
    %0 = vector.load %arg1[%c0, %c0_0] : memref<256x512xbf16, #tpu.memory_space<vmem>>, vector<256x512xbf16>
    %c0_1 = arith.constant 0 : index
    %c0_2 = arith.constant 0 : index
    %1 = vector.load %arg2[%c0_1, %c0_2] : memref<512x128xbf16, #tpu.memory_space<vmem>>, vector<512x128xbf16>
    %cst = arith.constant dense<0.000000e+00> : vector<256x128xf32>
    %2 = tpu.matmul %0, %1, %cst {dimension_numbers = #tpu.dot_dimension_numbers<[1], [0], [0], [1], [0, 0, 1, 1], [], []>} : vector<256x512xbf16>, vector<512x128xbf16>, vector<256x128xf32> -> vector<256x128xf32>
    %c16 = arith.constant 16 : index
    %c0_3 = arith.constant 0 : index
    %3 = vector.load %arg3[%c16, %c0_3] : memref<24x128xf32, #tpu.memory_space<vmem>>, vector<8x128xf32>
    %4 = vector.extract_strided_slice %3 {offsets = [0, 0], sizes = [1, 128], strides = [1, 1]} : vector<8x128xf32> to vector<1x128xf32>
    %5 = vector.extract_strided_slice %3 {offsets = [1, 0], sizes = [1, 128], strides = [1, 1]} : vector<8x128xf32> to vector<1x128xf32>
    %6 = vector.extract_strided_slice %3 {offsets = [2, 0], sizes = [1, 1], strides = [1, 1]} : vector<8x128xf32> to vector<1x1xf32>
    %7 = vector.broadcast %4 : vector<1x128xf32> to vector<256x128xf32>
    %8 = arith.addf %2, %7 : vector<256x128xf32>
    %9 = vector.shape_cast %8 : vector<256x128xf32> to vector<16x16x128xf32>
    %c0_4 = arith.constant 0 : index
    %c0_5 = arith.constant 0 : index
    %10 = vector.load %arg3[%c0_4, %c0_5] : memref<24x128xf32, #tpu.memory_space<vmem>>, vector<16x128xf32>
    %cst_6 = arith.constant 0.000000e+00 : f32
    %11 = vector.broadcast %cst_6 : f32 to vector<16x16x128xf32>
    %12 = arith.maximumf %9, %11 : vector<16x16x128xf32>
    %13 = vector.shape_cast %10 : vector<16x128xf32> to vector<1x16x128xf32>
    %14 = vector.broadcast %13 : vector<1x16x128xf32> to vector<16x16x128xf32>
    %15 = arith.mulf %12, %14 : vector<16x16x128xf32>
    %cst_7 = arith.constant dense<0xFF800000> : vector<16x128xf32>
    %16 = vector.multi_reduction <maximumf>, %15, %cst_7 [1] : vector<16x16x128xf32> to vector<16x128xf32>
    %17 = vector.broadcast %5 : vector<1x128xf32> to vector<16x128xf32>
    %18 = arith.mulf %16, %17 : vector<16x128xf32>
    %cst_8 = arith.constant dense<0.000000e+00> : vector<16xf32>
    %19 = vector.multi_reduction <add>, %18, %cst_8 [1] : vector<16x128xf32> to vector<16xf32>
    %20 = vector.shape_cast %19 : vector<16xf32> to vector<16x1xf32>
    %21 = vector.broadcast %6 : vector<1x1xf32> to vector<16x1xf32>
    %22 = arith.addf %20, %21 : vector<16x1xf32>
    %23 = arith.negf %22 : vector<16x1xf32>
    %24 = math.exp %23 : vector<16x1xf32>
    %cst_9 = arith.constant 1.000000e+00 : f32
    %25 = vector.broadcast %cst_9 : f32 to vector<16x1xf32>
    %26 = arith.addf %25, %24 : vector<16x1xf32>
    %27 = arith.divf %25, %26 : vector<16x1xf32>
    %28 = vector.shape_cast %27 : vector<16x1xf32> to vector<16x1xf32>
    %29 = vector.broadcast %28 : vector<16x1xf32> to vector<16x128xf32>
    %c0_10 = arith.constant 0 : index
    %c0_11 = arith.constant 0 : index
    %30 = vector.load %arg4[%c0_10, %c0_11] : memref<16x128xf32, #tpu.memory_space<vmem>>, vector<16x128xf32>
    tpu.vector_store %arg4[%c0_10, %c0_11], %29 {strides = array<i32>} : memref<16x128xf32, #tpu.memory_space<vmem>>, vector<16x128xf32>,
    return
  }
  func.func @transform_0(%arg0: i32) -> (i32, i32) {
    %c0_i32 = arith.constant 0 : i32
    %c0_i32_0 = arith.constant 0 : i32
    return %arg0, %c0_i32 : i32, i32
  }
  func.func @transform_1(%arg0: i32) -> (i32, i32) {
    %c0_i32 = arith.constant 0 : i32
    %c0_i32_0 = arith.constant 0 : i32
    %c0_i32_1 = arith.constant 0 : i32
    return %c0_i32, %c0_i32_0 : i32, i32
  }
  func.func @transform_2(%arg0: i32) -> (i32, i32) {
    %c0_i32 = arith.constant 0 : i32
    %c0_i32_0 = arith.constant 0 : i32
    %c0_i32_1 = arith.constant 0 : i32
    return %c0_i32, %c0_i32_0 : i32, i32
  }
  func.func @transform_3(%arg0: i32) -> (i32, i32) {
    %c0_i32 = arith.constant 0 : i32
    %c0_i32_0 = arith.constant 0 : i32
    return %arg0, %c0_i32 : i32, i32
  }
}

</mosaic_0001>

<bundles_post_ra>
// kernel: cnn_forward.1
= control target key start
LH: loop header
LB: loop body
LE: loop exit
PB: predicated region body
PF: predicated region fallthrough
CT: control target
= control target key end

     0   :  { %vm1197_vm0 = vcmask 1041409   ;;  %vm1200_vm1 = vcmask 1042434   ;;  %vm1203_vm2 = vcmask 1043459   ;;  %vm1206_vm3 = vcmask 1044484   ;;  %s2168_s1 = inlined_call_operand.vmem [shape: bf16[512,128], index: 1, kind: input, shape index: {}]   ;;  %s2169_s0 = inlined_call_operand.vmem [shape: bf16[256,512], index: 0, kind: input, shape index: {}]   ;;  %s2170_s2 = inlined_call_operand.vmem [shape: f32[24,128], index: 2, kind: input, shape index: {}]   ;;  %s2171_s3 = inlined_call_operand.vmem [shape: f32[16,128], index: 3, kind: output, shape index: {}]  }
   0x1   :  { %v1596_v0 = vld [vmem:[%s2168_s1 + $0x40] sm:$0xff]   ;;  %v1600_v4 = vld [vmem:[%s2168_s1 + $0x48] sm:$0xff]   ;;  %v1604_v8 = vld [vmem:[%s2168_s1 + $0x50] sm:$0xff]   ;;  %vm1209_vm4 = vcmask 1045509   ;;  %vm1212_vm5 = vcmask 1046534   ;;  %vm1215_vm6 = vcmask 1047559  }
   0x2   :  { %v1597_v1 = vld [vmem:[%s2168_s1 + $0xc0] sm:$0xff]   ;;  %1369 = vmatprep.subr.bf16.mxu0 %v1596_v0  ;;  %v1601_v5 = vld [vmem:[%s2168_s1 + $0xc8] sm:$0xff]   ;;  %v1605_v9 = vld [vmem:[%s2168_s1 + $0xd0] sm:$0xff]  }
   0x3   :  { %v1598_v2 = vld [vmem:[%s2168_s1] sm:$0xff]   ;;  %1481 = vmatprep.subr.bf16.mxu1 %v1597_v1  ;;  %v1602_v6 = vld [vmem:[%s2168_s1 + $0x8] sm:$0xff]   ;;  %v1606_v10 = vld [vmem:[%s2168_s1 + $0x10] sm:$0xff]  }
   0x4   :  { %v1599_v3 = vld [vmem:[%s2168_s1 + $0x80] sm:$0xff]   ;;  %1370 = vmatpush3.bf16.msra.mxu0 %v1598_v2  ;;  %v1603_v7 = vld [vmem:[%s2168_s1 + $0x88] sm:$0xff]   ;;  %v1607_v11 = vld [vmem:[%s2168_s1 + $0x90] sm:$0xff]  }
   0x5   :  { %1482 = vmatpush3.bf16.msra.mxu1 %v1599_v3  ;;  %1371 = vmatprep.subr.bf16.mxu0 %v1600_v4  ;;  %v1608_v12 = vld [vmem:[%s2168_s1 + $0x58] sm:$0xff]   ;;  %v1612_v16 = vld [vmem:[%s2168_s1 + $0x60] sm:$0xff]   ;;  %v1616_v20 = vld [vmem:[%s2168_s1 + $0x68] sm:$0xff]  }
   0x6   :  { %1483 = vmatprep.subr.bf16.mxu1 %v1601_v5  ;;  %v1609_v13 = vld [vmem:[%s2168_s1 + $0xd8] sm:$0xff]   ;;  %v1613_v17 = vld [vmem:[%s2168_s1 + $0xe0] sm:$0xff]   ;;  %v1617_v21 = vld [vmem:[%s2168_s1 + $0xe8] sm:$0xff]  }
   0x7   :  { %v1610_v14 = vld [vmem:[%s2168_s1 + $0x18] sm:$0xff]   ;;  %v1614_v18 = vld [vmem:[%s2168_s1 + $0x20] sm:$0xff]   ;;  %v1618_v22 = vld [vmem:[%s2168_s1 + $0x28] sm:$0xff]  }
   0x8   :  { %1372 = vmatpush3.bf16.msra.mxu0 %v1602_v6  ;;  %v1611_v15 = vld [vmem:[%s2168_s1 + $0x98] sm:$0xff]   ;;  %v1615_v19 = vld [vmem:[%s2168_s1 + $0xa0] sm:$0xff]   ;;  %v1619_v23 = vld [vmem:[%s2168_s1 + $0xa8] sm:$0xff]  }
   0x9   :  { %1484 = vmatpush3.bf16.msra.mxu1 %v1603_v7  ;;  %1373 = vmatprep.subr.bf16.mxu0 %v1604_v8  ;;  %v1620_v24 = vld [vmem:[%s2168_s1 + $0x70] sm:$0xff]   ;;  %v1624_v28 = vld [vmem:[%s2168_s1 + $0x78] sm:$0xff]  }
   0xa   :  { %1485 = vmatprep.subr.bf16.mxu1 %v1605_v9  ;;  %v1621_v25 = vld [vmem:[%s2168_s1 + $0xf0] sm:$0xff]   ;;  %v1625_v29 = vld [vmem:[%s2168_s1 + $0xf8] sm:$0xff]  }
   0xb   :  { %v1622_v26 = vld [vmem:[%s2168_s1 + $0x30] sm:$0xff]   ;;  %v1626_v30 = vld [vmem:[%s2168_s1 + $0x38] sm:$0xff]  }
   0xc   :  { %1374 = vmatpush3.bf16.msra.mxu0 %v1606_v10  ;;  %v1623_v27 = vld [vmem:[%s2168_s1 + $0xb0] sm:$0xff]   ;;  %v1627_v31 = vld [vmem:[%s2168_s1 + $0xb8] sm:$0xff]  }
   0xd   :  { %1486 = vmatpush3.bf16.msra.mxu1 %v1607_v11  ;;  %1375 = vmatprep.subr.bf16.mxu0 %v1608_v12  ;;  %v1628_v32 = vld [vmem:[%s2169_s0] ss:$16 sps:$4 sm:$0xff]   ;;  %v1630_v33 = vld [vmem:[%s2169_s0 + $0x4] ss:$16 sps:$4 sm:$0xff]   ;;  %v1631_v34 = vld [vmem:[%s2169_s0 + $0x8] ss:$16 sps:$4 sm:$0xff]  }
   0xe   :  { %1487 = vmatprep.subr.bf16.mxu1 %v1609_v13  ;;  %v1633_v35 = vld [vmem:[%s2169_s0 + $0xc] ss:$16 sps:$4 sm:$0xff]   ;;  %692 = vmatprep.mubr.bf16.mxu0 %v1630_v33  ;;  %v1634_v36 = vld [vmem:[%s2169_s0 + $0x24] ss:$16 sps:$4 sm:$0xff]   ;;  %v1638_v38 = vld [vmem:[%s2169_s0 + $0x20] ss:$16 sps:$4 sm:$0xff]  }
   0xf   :  { %853 = vmatprep.mubr.bf16.mxu1 %v1633_v35  ;;  %v1636_v37 = vld [vmem:[%s2169_s0 + $0x2c] ss:$16 sps:$4 sm:$0xff]   ;;  %v1639_v39 = vld [vmem:[%s2169_s0 + $0x28] ss:$16 sps:$4 sm:$0xff]   ;;  %v1640_v40 = vld [vmem:[%s2169_s0 + $0x44] ss:$16 sps:$4 sm:$0xff]  }
  0x10   :  { %1376 = vmatpush3.bf16.msra.mxu0 %v1610_v14  ;;  %v1642_v41 = vld [vmem:[%s2169_s0 + $0x4c] ss:$16 sps:$4 sm:$0xff]   ;;  %v1644_v42 = vld [vmem:[%s2169_s0 + $0x40] ss:$16 sps:$4 sm:$0xff]   ;;  %v1645_v43 = vld [vmem:[%s2169_s0 + $0x48] ss:$16 sps:$4 sm:$0xff]  }
  0x11   :  { %1488 = vmatpush3.bf16.msra.mxu1 %v1611_v15  ;;  %1377 = vmatprep.subr.bf16.mxu0 %v1612_v16  ;;  %v1646_v44 = vld [vmem:[%s2169_s0 + $0x64] ss:$16 sps:$4 sm:$0xff]   ;;  %v1648_v45 = vld [vmem:[%s2169_s0 + $0x6c] ss:$16 sps:$4 sm:$0xff]   ;;  %v1650_v46 = vld [vmem:[%s2169_s0 + $0x60] ss:$16 sps:$4 sm:$0xff]  }
  0x12   :  { %1489 = vmatprep.subr.bf16.mxu1 %v1613_v17  ;;  %v1651_v47 = vld [vmem:[%s2169_s0 + $0x68] ss:$16 sps:$4 sm:$0xff]   ;;  %v1652_v48 = vld [vmem:[%s2169_s0 + $0x84] ss:$16 sps:$4 sm:$0xff]   ;;  %v1654_v49 = vld [vmem:[%s2169_s0 + $0x8c] ss:$16 sps:$4 sm:$0xff]  }
  0x13   :  { %v1656_v50 = vld [vmem:[%s2169_s0 + $0x80] ss:$16 sps:$4 sm:$0xff]   ;;  %v1657_v51 = vld [vmem:[%s2169_s0 + $0x88] ss:$16 sps:$4 sm:$0xff]   ;;  %v1658_v52 = vld [vmem:[%s2169_s0 + $0xa4] ss:$16 sps:$4 sm:$0xff]  }
  0x14   :  { %1378 = vmatpush3.bf16.msra.mxu0 %v1614_v18  ;;  %v1660_v53 = vld [vmem:[%s2169_s0 + $0xac] ss:$16 sps:$4 sm:$0xff]   ;;  %v1662_v54 = vld [vmem:[%s2169_s0 + $0xa0] ss:$16 sps:$4 sm:$0xff]   ;;  %v1663_v55 = vld [vmem:[%s2169_s0 + $0xa8] ss:$16 sps:$4 sm:$0xff]  }
  0x15   :  { %1490 = vmatpush3.bf16.msra.mxu1 %v1615_v19  ;;  %1379 = vmatprep.subr.bf16.mxu0 %v1616_v20  ;;  %v1664_v56 = vld [vmem:[%s2169_s0 + $0xc4] ss:$16 sps:$4 sm:$0xff]   ;;  %v1666_v57 = vld [vmem:[%s2169_s0 + $0xcc] ss:$16 sps:$4 sm:$0xff]   ;;  %v1668_v58 = vld [vmem:[%s2169_s0 + $0xc0] ss:$16 sps:$4 sm:$0xff]  }
  0x16   :  { %1491 = vmatprep.subr.bf16.mxu1 %v1617_v21  ;;  %v1669_v59 = vld [vmem:[%s2169_s0 + $0xc8] ss:$16 sps:$4 sm:$0xff]   ;;  %v1670_v60 = vld [vmem:[%s2169_s0 + $0xe4] ss:$16 sps:$4 sm:$0xff]   ;;  %v1672_v61 = vld [vmem:[%s2169_s0 + $0xec] ss:$16 sps:$4 sm:$0xff]  }
  0x17   :  { %v1674_v62 = vld [vmem:[%s2169_s0 + $0xe0] ss:$16 sps:$4 sm:$0xff]   ;;  %v1675_v63 = vld [vmem:[%s2169_s0 + $0xe8] ss:$16 sps:$4 sm:$0xff]   ;;  %v1676_v0 = vld [vmem:[%s2169_s0 + $0x104] ss:$16 sps:$4 sm:$0xff]  }
  0x18   :  { %1380 = vmatpush3.bf16.msra.mxu0 %v1618_v22  ;;  %v1678_v1 = vld [vmem:[%s2169_s0 + $0x10c] ss:$16 sps:$4 sm:$0xff]   ;;  %v1680_v2 = vld [vmem:[%s2169_s0 + $0x100] ss:$16 sps:$4 sm:$0xff]   ;;  %v1681_v3 = vld [vmem:[%s2169_s0 + $0x108] ss:$16 sps:$4 sm:$0xff]  }
  0x19   :  { %1492 = vmatpush3.bf16.msra.mxu1 %v1619_v23  ;;  %1381 = vmatprep.subr.bf16.mxu0 %v1620_v24  ;;  %v1682_v4 = vld [vmem:[%s2169_s0 + $0x124] ss:$16 sps:$4 sm:$0xff]   ;;  %v1684_v5 = vld [vmem:[%s2169_s0 + $0x12c] ss:$16 sps:$4 sm:$0xff]   ;;  %v1686_v6 = vld [vmem:[%s2169_s0 + $0x120] ss:$16 sps:$4 sm:$0xff]  }
  0x1a   :  { %1493 = vmatprep.subr.bf16.mxu1 %v1621_v25  ;;  %v1687_v7 = vld [vmem:[%s2169_s0 + $0x128] ss:$16 sps:$4 sm:$0xff]   ;;  %v1688_v8 = vld [vmem:[%s2169_s0 + $0x144] ss:$16 sps:$4 sm:$0xff]   ;;  %v1690_v9 = vld [vmem:[%s2169_s0 + $0x14c] ss:$16 sps:$4 sm:$0xff]  }
  0x1b   :  { %v1692_v10 = vld [vmem:[%s2169_s0 + $0x140] ss:$16 sps:$4 sm:$0xff]   ;;  %v1693_v11 = vld [vmem:[%s2169_s0 + $0x148] ss:$16 sps:$4 sm:$0xff]   ;;  %v1694_v12 = vld [vmem:[%s2169_s0 + $0x164] ss:$16 sps:$4 sm:$0xff]  }
  0x1c   :  { %1382 = vmatpush3.bf16.msra.mxu0 %v1622_v26  ;;  %v1696_v13 = vld [vmem:[%s2169_s0 + $0x16c] ss:$16 sps:$4 sm:$0xff]   ;;  %v1698_v14 = vld [vmem:[%s2169_s0 + $0x160] ss:$16 sps:$4 sm:$0xff]   ;;  %v1699_v15 = vld [vmem:[%s2169_s0 + $0x168] ss:$16 sps:$4 sm:$0xff]  }
  0x1d   :  { %1494 = vmatpush3.bf16.msra.mxu1 %v1623_v27  ;;  %1383 = vmatprep.subr.bf16.mxu0 %v1624_v28  ;;  %v1700_v16 = vld [vmem:[%s2169_s0 + $0x184] ss:$16 sps:$4 sm:$0xff]   ;;  %v1702_v17 = vld [vmem:[%s2169_s0 + $0x18c] ss:$16 sps:$4 sm:$0xff]   ;;  %v1704_v18 = vld [vmem:[%s2169_s0 + $0x180] ss:$16 sps:$4 sm:$0xff]  }
  0x1e   :  { %1495 = vmatprep.subr.bf16.mxu1 %v1625_v29  ;;  %v1705_v19 = vld [vmem:[%s2169_s0 + $0x188] ss:$16 sps:$4 sm:$0xff]   ;;  %v1706_v20 = vld [vmem:[%s2169_s0 + $0x1a4] ss:$16 sps:$4 sm:$0xff]   ;;  %v1708_v21 = vld [vmem:[%s2169_s0 + $0x1ac] ss:$16 sps:$4 sm:$0xff]  }
  0x1f   :  { %v1710_v22 = vld [vmem:[%s2169_s0 + $0x1a0] ss:$16 sps:$4 sm:$0xff]   ;;  %v1711_v23 = vld [vmem:[%s2169_s0 + $0x1a8] ss:$16 sps:$4 sm:$0xff]   ;;  %v1712_v24 = vld [vmem:[%s2169_s0 + $0x1c4] ss:$16 sps:$4 sm:$0xff]  }
  0x20   :  { %1384 = vmatpush3.bf16.msra.mxu0 %v1626_v30  ;;  %v1714_v25 = vld [vmem:[%s2169_s0 + $0x1cc] ss:$16 sps:$4 sm:$0xff]   ;;  %v1716_v26 = vld [vmem:[%s2169_s0 + $0x1c0] ss:$16 sps:$4 sm:$0xff]   ;;  %v1717_v27 = vld [vmem:[%s2169_s0 + $0x1c8] ss:$16 sps:$4 sm:$0xff]  }
  0x21   :  { %1496 = vmatpush3.bf16.msra.mxu1 %v1627_v31  ;;  %v1718_v28 = vld [vmem:[%s2169_s0 + $0x1e4] ss:$16 sps:$4 sm:$0xff]   ;;  %v1720_v29 = vld [vmem:[%s2169_s0 + $0x1ec] ss:$16 sps:$4 sm:$0xff]   ;;  %v1722_v30 = vld [vmem:[%s2169_s0 + $0x1e0] ss:$16 sps:$4 sm:$0xff]  }
  0x22   :  { %v1723_v31 = vld [vmem:[%s2169_s0 + $0x1e8] ss:$16 sps:$4 sm:$0xff]   ;;  %v2047_v35 = vld [vmem:[%s2170_s2 + $0x10] sm:$0xff] }
  0x23   :  { %693 = vmatmul.mubr.bf16.vlgmr.msra.gmra.mrb[0].mxu0 %v1628_v32  ;;  %v144_v32 = vlaneseq }
  0x24   :  { %854 = vmatmul.mubr.bf16.vlgmr.msra.gmra.mrb[0].mxu1 %v1631_v34  ;;  %700 = vmatprep.mubr.bf16.mxu0 %v1634_v36 }
  0x25   :  { %861 = vmatprep.mubr.bf16.mxu1 %v1636_v37  ;;  %v2041_v33 = vshrl.u32 %v144_v32, 7 }
  0x27   :  { %v146_v34 = vsub.s32 0, %v2041_v33 }
  0x29   :  { %v2050_v37 = vrot.slane %v2047_v35, %v146_v34 }
  0x2b   :  { %701 = vmatmul.mubr.bf16.gmra.mrb[4].mxu0 %v1638_v38 }
  0x2c   :  { %862 = vmatmul.mubr.bf16.gmra.mrb[4].mxu1 %v1639_v39  ;;  %708 = vmatprep.mubr.bf16.mxu0 %v1640_v40 }
  0x2d   :  { %869 = vmatprep.mubr.bf16.mxu1 %v1642_v41 }
  0x33   :  { %709 = vmatmul.mubr.bf16.gmra.mrb[8].mxu0 %v1644_v42 }
  0x34   :  { %870 = vmatmul.mubr.bf16.gmra.mrb[8].mxu1 %v1645_v43  ;;  %716 = vmatprep.mubr.bf16.mxu0 %v1646_v44 }
  0x35   :  { %877 = vmatprep.mubr.bf16.mxu1 %v1648_v45 }
  0x3b   :  { %717 = vmatmul.mubr.bf16.gmra.mrb[12].mxu0 %v1650_v46 }
  0x3c   :  { %878 = vmatmul.mubr.bf16.gmra.mrb[12].mxu1 %v1651_v47  ;;  %724 = vmatprep.mubr.bf16.mxu0 %v1652_v48 }
  0x3d   :  { %885 = vmatprep.mubr.bf16.mxu1 %v1654_v49 }
  0x43   :  { %725 = vmatmul.mubr.bf16.gmra.mrb[16].mxu0 %v1656_v50 }
  0x44   :  { %886 = vmatmul.mubr.bf16.gmra.mrb[16].mxu1 %v1657_v51  ;;  %732 = vmatprep.mubr.bf16.mxu0 %v1658_v52 }
  0x45   :  { %893 = vmatprep.mubr.bf16.mxu1 %v1660_v53 }
  0x4b   :  { %733 = vmatmul.mubr.bf16.gmra.mrb[20].mxu0 %v1662_v54 }
  0x4c   :  { %894 = vmatmul.mubr.bf16.gmra.mrb[20].mxu1 %v1663_v55  ;;  %740 = vmatprep.mubr.bf16.mxu0 %v1664_v56  ;;  %v2057_v55 = vld [vmem:[%s2170_s2] sm:$0xff]  ;;  %v2062_v56 = vld [vmem:[%s2170_s2 + $0x8] sm:$0xff] }
  0x4d   :  { %901 = vmatprep.mubr.bf16.mxu1 %v1666_v57 }
  0x53   :  { %741 = vmatmul.mubr.bf16.gmra.mrb[24].mxu0 %v1668_v58 }
  0x54   :  { %902 = vmatmul.mubr.bf16.gmra.mrb[24].mxu1 %v1669_v59  ;;  %748 = vmatprep.mubr.bf16.mxu0 %v1670_v60 }
  0x55   :  { %909 = vmatprep.mubr.bf16.mxu1 %v1672_v61 }
  0x5b   :  { %749 = vmatmul.mubr.bf16.gmra.mrb[28].mxu0 %v1674_v62 }
  0x5c   :  { %910 = vmatmul.mubr.bf16.gmra.mrb[28].mxu1 %v1675_v63  ;;  %756 = vmatprep.mubr.bf16.mxu0 %v1676_v0 }
  0x5d   :  { %917 = vmatprep.mubr.bf16.mxu1 %v1678_v1 }
  0x63   :  { %757 = vmatmul.mubr.bf16.gmra.mrb[32].mxu0 %v1680_v2 }
  0x64   :  { %918 = vmatmul.mubr.bf16.gmra.mrb[32].mxu1 %v1681_v3  ;;  %764 = vmatprep.mubr.bf16.mxu0 %v1682_v4 }
  0x65   :  { %925 = vmatprep.mubr.bf16.mxu1 %v1684_v5 }
  0x6b   :  { %765 = vmatmul.mubr.bf16.gmra.mrb[36].mxu0 %v1686_v6 }
  0x6c   :  { %926 = vmatmul.mubr.bf16.gmra.mrb[36].mxu1 %v1687_v7  ;;  %772 = vmatprep.mubr.bf16.mxu0 %v1688_v8 }
  0x6d   :  { %933 = vmatprep.mubr.bf16.mxu1 %v1690_v9 }
  0x73   :  { %773 = vmatmul.mubr.bf16.gmra.mrb[40].mxu0 %v1692_v10 }
  0x74   :  { %934 = vmatmul.mubr.bf16.gmra.mrb[40].mxu1 %v1693_v11  ;;  %780 = vmatprep.mubr.bf16.mxu0 %v1694_v12 }
  0x75   :  { %941 = vmatprep.mubr.bf16.mxu1 %v1696_v13 }
  0x7b   :  { %781 = vmatmul.mubr.bf16.gmra.mrb[44].mxu0 %v1698_v14 }
  0x7c   :  { %942 = vmatmul.mubr.bf16.gmra.mrb[44].mxu1 %v1699_v15  ;;  %788 = vmatprep.mubr.bf16.mxu0 %v1700_v16 }
  0x7d   :  { %949 = vmatprep.mubr.bf16.mxu1 %v1702_v17 }
  0x83   :  { %789 = vmatmul.mubr.bf16.gmra.mrb[48].mxu0 %v1704_v18 }
  0x84   :  { %950 = vmatmul.mubr.bf16.gmra.mrb[48].mxu1 %v1705_v19  ;;  %796 = vmatprep.mubr.bf16.mxu0 %v1706_v20 }
  0x85   :  { %957 = vmatprep.mubr.bf16.mxu1 %v1708_v21 }
  0x8b   :  { %797 = vmatmul.mubr.bf16.gmra.mrb[52].mxu0 %v1710_v22 }
  0x8c   :  { %958 = vmatmul.mubr.bf16.gmra.mrb[52].mxu1 %v1711_v23  ;;  %804 = vmatprep.mubr.bf16.mxu0 %v1712_v24 }
  0x8d   :  { %965 = vmatprep.mubr.bf16.mxu1 %v1714_v25 }
  0x93   :  { %805 = vmatmul.mubr.bf16.gmra.mrb[56].mxu0 %v1716_v26 }
  0x94   :  { %966 = vmatmul.mubr.bf16.gmra.mrb[56].mxu1 %v1717_v27  ;;  %812 = vmatprep.mubr.bf16.mxu0 %v1718_v28 }
  0x95   :  { %973 = vmatprep.mubr.bf16.mxu1 %v1720_v29 }
  0x9b   :  { %813 = vmatmul.mubr.bf16.gmra.mrb[60].mxu0 %v1722_v30 }
  0x9c   :  { %974 = vmatmul.mubr.bf16.gmra.mrb[60].mxu1 %v1723_v31 }
  0xf6   :  { %v1385_v36 = vpop.f32.mrb[0].mxu0 }
  0xf7   :  { %v1497_v38 = vpop.f32.mrb[0].mxu1  ;;  %v1386_v39 = vpop.f32.mrb[1].mxu0 }
  0xf8   :  { %v1387_v40 = vadd.f32 %v1386_v39, %v1385_v36  ;;  %v1498_v41 = vpop.f32.mrb[1].mxu1  ;;  %v1388_v42 = vpop.f32.mrb[2].mxu0 }
  0xf9   :  { %v1499_v43 = vadd.f32 %v1498_v41, %v1497_v38  ;;  %v1500_v44 = vpop.f32.mrb[2].mxu1  ;;  %v1389_v45 = vpop.f32.mrb[3].mxu0 }
  0xfa   :  { %v695_v46 = vadd.f32 %v1387_v40, %v2050_v37  ;;  %v1390_v47 = vadd.f32 %v1389_v45, %v1388_v42  ;;  %v1501_v48 = vpop.f32.mrb[3].mxu1 }
  0xfb   :  { %v1502_v49 = vadd.f32 %v1501_v48, %v1500_v44 }
  0xfc   :  { %v856_v50 = vadd.f32 %v1499_v43, %v695_v46  ;;  %v698_v51 = vadd.f32 %v1390_v47, %v2050_v37 }
  0xfe   :  { %v984_v52 = vmax.f32 %v856_v50, 0.0  ;;  %v859_v53 = vadd.f32 %v1502_v49, %v698_v51  ;;  %v1391_v54 = vpop.f32.mrb[4].mxu0 }
  0xff   :  { %v1503_v57 = vpop.f32.mrb[4].mxu1  ;;  %v1392_v58 = vpop.f32.mrb[5].mxu0 }
 0x100   :  { %v985_v59 = vmax.f32 %v859_v53, 0.0  ;;  %v1393_v60 = vadd.f32 %v1392_v58, %v1391_v54  ;;  %v1504_v61 = vpop.f32.mrb[5].mxu1  ;;  %v1394_v62 = vpop.f32.mrb[6].mxu0  ;;  %v1016_v2 = vmul.f32 %v984_v52, %v2057_v55 }
 0x101   :  { %v1505_v63 = vadd.f32 %v1504_v61, %v1503_v57  ;;  %v1506_v0 = vpop.f32.mrb[6].mxu1  ;;  %v1395_v1 = vpop.f32.mrb[7].mxu0  ;;  %v1162_v61 = vsub.s32 1, %v2041_v33 }
 0x102   :  { %v1017_v3 = vmul.f32 %v985_v59, %v2062_v56  ;;  %v703_v4 = vadd.f32 %v1393_v60, %v2050_v37  ;;  %v1396_v5 = vadd.f32 %v1395_v1, %v1394_v62  ;;  %v1507_v6 = vpop.f32.mrb[7].mxu1 }
 0x103   :  { %v1508_v7 = vadd.f32 %v1507_v6, %v1506_v0 }
 0x104   :  { %v1048_v8 = vmax.f32 %v1016_v2, %v1017_v3  ;;  %v864_v9 = vadd.f32 %v1505_v63, %v703_v4  ;;  %v706_v10 = vadd.f32 %v1396_v5, %v2050_v37 }
 0x106   :  { %v1049_v11 = vrot.slane %v1048_v8, 4  ;;  %v986_v12 = vmax.f32 %v864_v9, 0.0  ;;  %v867_v13 = vadd.f32 %v1508_v7, %v706_v10  ;;  %v1397_v14 = vpop.f32.mrb[8].mxu0  ;;  %v2078_v9 = vrot.slane %v2047_v35, %v1162_v61 }
 0x107   :  { %v1509_v15 = vpop.f32.mrb[8].mxu1  ;;  %v1398_v16 = vpop.f32.mrb[9].mxu0 }
 0x108   :  { %v1050_v17 = vmax.f32 %v1048_v8, %v1049_v11  ;;  %v987_v18 = vmax.f32 %v867_v13, 0.0  ;;  %v1399_v19 = vadd.f32 %v1398_v16, %v1397_v14  ;;  %v1510_v20 = vpop.f32.mrb[9].mxu1  ;;  %v1400_v21 = vpop.f32.mrb[10].mxu0  ;;  %v1018_v25 = vmul.f32 %v986_v12, %v2057_v55 }
 0x109   :  { %v1511_v22 = vadd.f32 %v1510_v20, %v1509_v15  ;;  %v1512_v23 = vpop.f32.mrb[10].mxu1  ;;  %v1401_v24 = vpop.f32.mrb[11].mxu0 }
 0x10a   :  { %v1019_v26 = vmul.f32 %v987_v18, %v2062_v56  ;;  %v711_v27 = vadd.f32 %v1399_v19, %v2050_v37  ;;  %v1402_v28 = vadd.f32 %v1401_v24, %v1400_v21  ;;  %v1513_v29 = vpop.f32.mrb[11].mxu1  ;;  %v1051_v30 = vrot.slane %v1050_v17, 2 }
 0x10b   :  { %v1514_v31 = vadd.f32 %v1513_v29, %v1512_v23 }
 0x10c   :  { %v1055_v32 = vmax.f32 %v1018_v25, %v1019_v26  ;;  %v872_v34 = vadd.f32 %v1511_v22, %v711_v27  ;;  %v714_v36 = vadd.f32 %v1402_v28, %v2050_v37  ;;  %v1052_v42 = vmax.f32 %v1050_v17, %v1051_v30 }
 0x10e   :  { %v1056_v38 = vrot.slane %v1055_v32, 4  ;;  %v988_v39 = vmax.f32 %v872_v34, 0.0  ;;  %v875_v40 = vadd.f32 %v1514_v31, %v714_v36  ;;  %v1403_v41 = vpop.f32.mrb[12].mxu0  ;;  %v1053_v60 = vrot.slane %v1052_v42, 1 }
 0x10f   :  { %v1515_v43 = vpop.f32.mrb[12].mxu1  ;;  %v1404_v44 = vpop.f32.mrb[13].mxu0 }
 0x110   :  { %v1057_v45 = vmax.f32 %v1055_v32, %v1056_v38  ;;  %v989_v46 = vmax.f32 %v875_v40, 0.0  ;;  %v1516_v47 = vpop.f32.mrb[13].mxu1  ;;  %v1406_v48 = vpop.f32.mrb[14].mxu0  ;;  %v1405_v49 = vadd.f32 %v1404_v44, %v1403_v41  ;;  %v1020_v54 = vmul.f32 %v988_v39, %v2057_v55 }
 0x111   :  { %v1517_v50 = vadd.f32 %v1516_v47, %v1515_v43  ;;  %v1518_v51 = vpop.f32.mrb[14].mxu1  ;;  %v1407_v52 = vpop.f32.mrb[15].mxu0  ;;  %v1054_v8 = vmax.f32 %v1052_v42, %v1053_v60 }
 0x112   :  { %v1058_v53 = vrot.slane %v1057_v45, 2  ;;  %v1021_v57 = vmul.f32 %v989_v46, %v2062_v56  ;;  %v1408_v58 = vadd.f32 %v1407_v52, %v1406_v48  ;;  %v1519_v59 = vpop.f32.mrb[15].mxu1  ;;  %v719_v62 = vadd.f32 %v1405_v49, %v2050_v37 }
 0x113   :  { %v1520_v63 = vadd.f32 %v1519_v59, %v1518_v51  ;;  %v1164_v28 = vmul.f32 %v2078_v9, %v1054_v8 }
 0x114   :  { %v1059_v0 = vmax.f32 %v1057_v45, %v1058_v53  ;;  %v1062_v1 = vmax.f32 %v1020_v54, %v1021_v57  ;;  %v722_v2 = vadd.f32 %v1408_v58, %v2050_v37  ;;  %v880_v3 = vadd.f32 %v1517_v50, %v719_v62 }
 0x116   :  { %v1060_v4 = vrot.slane %v1059_v0, 1  ;;  %v1063_v5 = vrot.slane %v1062_v1, 4  ;;  %v883_v6 = vadd.f32 %v1520_v63, %v722_v2  ;;  %v1409_v7 = vpop.f32.mrb[16].mxu0  ;;  %v990_v10 = vmax.f32 %v880_v3, 0.0 }
 0x117   :  { %v1521_v11 = vpop.f32.mrb[16].mxu1  ;;  %v1410_v12 = vpop.f32.mrb[17].mxu0 }
 0x118   :  { %v1061_v13 = vmax.f32 %v1059_v0, %v1060_v4  ;;  %v1064_v14 = vmax.f32 %v1062_v1, %v1063_v5  ;;  %v991_v15 = vmax.f32 %v883_v6, 0.0  ;;  %v1411_v16 = vadd.f32 %v1410_v12, %v1409_v7  ;;  %v1522_v17 = vpop.f32.mrb[17].mxu1  ;;  %v1412_v18 = vpop.f32.mrb[18].mxu0 }
 0x119   :  { %v1022_v19 = vmul.f32 %v990_v10, %v2057_v55  ;;  %v1523_v20 = vadd.f32 %v1522_v17, %v1521_v11  ;;  %v1524_v21 = vpop.f32.mrb[18].mxu1  ;;  %v1413_v22 = vpop.f32.mrb[19].mxu0 }
 0x11a   :  { %v1165_v23 = vmul.f32 %v2078_v9, %v1061_v13  ;;  %v1065_v24 = vrot.slane %v1064_v14, 2  ;;  %v1023_v25 = vmul.f32 %v991_v15, %v2062_v56  ;;  %v727_v26 = vadd.f32 %v1411_v16, %v2050_v37  ;;  %v1525_v27 = vpop.f32.mrb[19].mxu1 }
 0x11b   :  { %v1414_v29 = vadd.f32 %v1413_v22, %v1412_v18  ;;  %v1526_v30 = vadd.f32 %v1525_v27, %v1524_v21 }
 0x11c   :  { %v1196_v31 = vrot.slane %v1165_v23, 7  ;;  %v1066_v32 = vmax.f32 %v1064_v14, %v1065_v24  ;;  %v1069_v34 = vmax.f32 %v1022_v19, %v1023_v25  ;;  %v888_v36 = vadd.f32 %v1523_v20, %v727_v26 }
 0x11d   :  { %v730_v38 = vadd.f32 %v1414_v29, %v2050_v37 }
 0x11e   :  { %v1067_v39 = vrot.slane %v1066_v32, 1  ;;  %v1070_v40 = vrot.slane %v1069_v34, 4  ;;  %v1415_v41 = vpop.f32.mrb[20].mxu0  ;;  %v1198_v42 = vsel %vm1197_vm0, %v1196_v31, %v1164_v28  ;;  %v992_v43 = vmax.f32 %v888_v36, 0.0 }
 0x11f   :  { %v891_v44 = vadd.f32 %v1526_v30, %v730_v38  ;;  %v1527_v45 = vpop.f32.mrb[20].mxu1  ;;  %v1416_v46 = vpop.f32.mrb[21].mxu0 }
 0x120   :  { %v1068_v47 = vmax.f32 %v1066_v32, %v1067_v39  ;;  %v1071_v48 = vmax.f32 %v1069_v34, %v1070_v40  ;;  %v1417_v49 = vadd.f32 %v1416_v46, %v1415_v41  ;;  %v1528_v50 = vpop.f32.mrb[21].mxu1  ;;  %v1418_v51 = vpop.f32.mrb[22].mxu0  ;;  %v1024_v63 = vmul.f32 %v992_v43, %v2057_v55 }
 0x121   :  { %v993_v52 = vmax.f32 %v891_v44, 0.0  ;;  %v1529_v53 = vadd.f32 %v1528_v50, %v1527_v45  ;;  %v1530_v54 = vpop.f32.mrb[22].mxu1  ;;  %v1419_v57 = vpop.f32.mrb[23].mxu0 }
 0x122   :  { %v1166_v58 = vmul.f32 %v2078_v9, %v1068_v47  ;;  %v1072_v59 = vrot.slane %v1071_v48, 2  ;;  %v735_v60 = vadd.f32 %v1417_v49, %v2050_v37  ;;  %v1420_v61 = vadd.f32 %v1419_v57, %v1418_v51  ;;  %v1531_v62 = vpop.f32.mrb[23].mxu1 }
 0x123   :  { %v1025_v0 = vmul.f32 %v993_v52, %v2062_v56  ;;  %v1532_v1 = vadd.f32 %v1531_v62, %v1530_v54 }
 0x124   :  { %v1073_v2 = vmax.f32 %v1071_v48, %v1072_v59  ;;  %v896_v3 = vadd.f32 %v1529_v53, %v735_v60  ;;  %v738_v4 = vadd.f32 %v1420_v61, %v2050_v37  ;;  %v1199_v5 = vrot.slane %v1166_v58, 6 }
 0x125   :  { %v1076_v6 = vmax.f32 %v1024_v63, %v1025_v0 }
 0x126   :  { %v1074_v7 = vrot.slane %v1073_v2, 1  ;;  %v994_v8 = vmax.f32 %v896_v3, 0.0  ;;  %v899_v10 = vadd.f32 %v1532_v1, %v738_v4  ;;  %v1421_v11 = vpop.f32.mrb[24].mxu0  ;;  %v1201_v12 = vsel %vm1200_vm1, %v1199_v5, %v1198_v42 }
 0x127   :  { %v1077_v13 = vrot.slane %v1076_v6, 4  ;;  %v1533_v14 = vpop.f32.mrb[24].mxu1  ;;  %v1422_v15 = vpop.f32.mrb[25].mxu0 }
 0x128   :  { %v1075_v16 = vmax.f32 %v1073_v2, %v1074_v7  ;;  %v995_v17 = vmax.f32 %v899_v10, 0.0  ;;  %v1423_v18 = vadd.f32 %v1422_v15, %v1421_v11  ;;  %v1534_v19 = vpop.f32.mrb[25].mxu1  ;;  %v1424_v20 = vpop.f32.mrb[26].mxu0  ;;  %v1026_v22 = vmul.f32 %v994_v8, %v2057_v55 }
 0x129   :  { %v1078_v21 = vmax.f32 %v1076_v6, %v1077_v13  ;;  %v1535_v23 = vadd.f32 %v1534_v19, %v1533_v14  ;;  %v1536_v24 = vpop.f32.mrb[26].mxu1  ;;  %v1425_v25 = vpop.f32.mrb[27].mxu0 }
 0x12a   :  { %v1027_v26 = vmul.f32 %v995_v17, %v2062_v56  ;;  %v743_v27 = vadd.f32 %v1423_v18, %v2050_v37  ;;  %v1426_v28 = vadd.f32 %v1425_v25, %v1424_v20  ;;  %v1537_v29 = vpop.f32.mrb[27].mxu1  ;;  %v1167_v30 = vmul.f32 %v2078_v9, %v1075_v16 }
 0x12b   :  { %v1079_v31 = vrot.slane %v1078_v21, 2  ;;  %v1538_v32 = vadd.f32 %v1537_v29, %v1536_v24 }
 0x12c   :  { %v1083_v34 = vmax.f32 %v1026_v22, %v1027_v26  ;;  %v904_v36 = vadd.f32 %v1535_v23, %v743_v27  ;;  %v746_v38 = vadd.f32 %v1426_v28, %v2050_v37  ;;  %v1202_v39 = vrot.slane %v1167_v30, 5 }
 0x12d   :  { %v1080_v40 = vmax.f32 %v1078_v21, %v1079_v31 }
 0x12e   :  { %v1084_v41 = vrot.slane %v1083_v34, 4  ;;  %v996_v42 = vmax.f32 %v904_v36, 0.0  ;;  %v907_v43 = vadd.f32 %v1538_v32, %v746_v38  ;;  %v1427_v44 = vpop.f32.mrb[28].mxu0  ;;  %v1204_v45 = vsel %vm1203_vm2, %v1202_v39, %v1201_v12 }
 0x12f   :  { %v1081_v46 = vrot.slane %v1080_v40, 1  ;;  %v1539_v47 = vpop.f32.mrb[28].mxu1  ;;  %v1428_v48 = vpop.f32.mrb[29].mxu0 }
 0x130   :  { %v1085_v49 = vmax.f32 %v1083_v34, %v1084_v41  ;;  %v997_v50 = vmax.f32 %v907_v43, 0.0  ;;  %v1429_v51 = vadd.f32 %v1428_v48, %v1427_v44  ;;  %v1540_v52 = vpop.f32.mrb[29].mxu1  ;;  %v1430_v53 = vpop.f32.mrb[30].mxu0  ;;  %v1028_v57 = vmul.f32 %v996_v42, %v2057_v55 }
 0x131   :  { %v1082_v54 = vmax.f32 %v1080_v40, %v1081_v46  ;;  %v1541_v58 = vadd.f32 %v1540_v52, %v1539_v47  ;;  %v1542_v59 = vpop.f32.mrb[30].mxu1  ;;  %v1431_v60 = vpop.f32.mrb[31].mxu0 }
 0x132   :  { %v1086_v61 = vrot.slane %v1085_v49, 2  ;;  %v1029_v62 = vmul.f32 %v997_v50, %v2062_v56  ;;  %v751_v63 = vadd.f32 %v1429_v51, %v2050_v37  ;;  %v1432_v0 = vadd.f32 %v1431_v60, %v1430_v53  ;;  %v1543_v1 = vpop.f32.mrb[31].mxu1 }
 0x133   :  { %v1544_v2 = vadd.f32 %v1543_v1, %v1542_v59  ;;  %v1168_v3 = vmul.f32 %v2078_v9, %v1082_v54 }
 0x134   :  { %v1087_v4 = vmax.f32 %v1085_v49, %v1086_v61  ;;  %v1090_v5 = vmax.f32 %v1028_v57, %v1029_v62  ;;  %v912_v6 = vadd.f32 %v1541_v58, %v751_v63  ;;  %v754_v7 = vadd.f32 %v1432_v0, %v2050_v37 }
 0x135   :  { %v1205_v8 = vrot.slane %v1168_v3, 4 }
 0x136   :  { %v1088_v10 = vrot.slane %v1087_v4, 1  ;;  %v1091_v11 = vrot.slane %v1090_v5, 4  ;;  %v998_v12 = vmax.f32 %v912_v6, 0.0  ;;  %v915_v13 = vadd.f32 %v1544_v2, %v754_v7  ;;  %v1433_v14 = vpop.f32.mrb[32].mxu0 }
 0x137   :  { %v1545_v15 = vpop.f32.mrb[32].mxu1  ;;  %v1434_v16 = vpop.f32.mrb[33].mxu0  ;;  %v1207_v17 = vsel %vm1206_vm3, %v1205_v8, %v1204_v45 }
 0x138   :  { %v1092_v18 = vmax.f32 %v1090_v5, %v1091_v11  ;;  %v999_v19 = vmax.f32 %v915_v13, 0.0  ;;  %v1435_v20 = vadd.f32 %v1434_v16, %v1433_v14  ;;  %v1546_v21 = vpop.f32.mrb[33].mxu1  ;;  %v1436_v22 = vpop.f32.mrb[34].mxu0  ;;  %v1030_v23 = vmul.f32 %v998_v12, %v2057_v55 }
 0x139   :  { %v1547_v24 = vadd.f32 %v1546_v21, %v1545_v15  ;;  %v1548_v25 = vpop.f32.mrb[34].mxu1  ;;  %v1437_v26 = vpop.f32.mrb[35].mxu0  ;;  %v1089_v27 = vmax.f32 %v1087_v4, %v1088_v10 }
 0x13a   :  { %v1093_v28 = vrot.slane %v1092_v18, 2  ;;  %v1031_v29 = vmul.f32 %v999_v19, %v2062_v56  ;;  %v759_v30 = vadd.f32 %v1435_v20, %v2050_v37  ;;  %v1438_v31 = vadd.f32 %v1437_v26, %v1436_v22  ;;  %v1549_v32 = vpop.f32.mrb[35].mxu1 }
 0x13b   :  { %v1550_v34 = vadd.f32 %v1549_v32, %v1548_v25  ;;  %v1169_v36 = vmul.f32 %v2078_v9, %v1089_v27 }
 0x13c   :  { %v1097_v38 = vmax.f32 %v1030_v23, %v1031_v29  ;;  %v920_v39 = vadd.f32 %v1547_v24, %v759_v30  ;;  %v762_v40 = vadd.f32 %v1438_v31, %v2050_v37  ;;  %v1094_v41 = vmax.f32 %v1092_v18, %v1093_v28 }
 0x13d   :  { %v1208_v42 = vrot.slane %v1169_v36, 3 }
 0x13e   :  { %v1098_v43 = vrot.slane %v1097_v38, 4  ;;  %v1000_v44 = vmax.f32 %v920_v39, 0.0  ;;  %v923_v45 = vadd.f32 %v1550_v34, %v762_v40  ;;  %v1439_v46 = vpop.f32.mrb[36].mxu0  ;;  %v1095_v47 = vrot.slane %v1094_v41, 1 }
 0x13f   :  { %v1551_v48 = vpop.f32.mrb[36].mxu1  ;;  %v1440_v49 = vpop.f32.mrb[37].mxu0  ;;  %v1210_v50 = vsel %vm1209_vm4, %v1208_v42, %v1207_v17 }
 0x140   :  { %v1099_v51 = vmax.f32 %v1097_v38, %v1098_v43  ;;  %v1001_v52 = vmax.f32 %v923_v45, 0.0  ;;  %v1441_v53 = vadd.f32 %v1440_v49, %v1439_v46  ;;  %v1552_v54 = vpop.f32.mrb[37].mxu1  ;;  %v1442_v57 = vpop.f32.mrb[38].mxu0  ;;  %v1032_v58 = vmul.f32 %v1000_v44, %v2057_v55 }
 0x141   :  { %v1553_v59 = vadd.f32 %v1552_v54, %v1551_v48  ;;  %v1554_v60 = vpop.f32.mrb[38].mxu1  ;;  %v1443_v61 = vpop.f32.mrb[39].mxu0  ;;  %v1096_v62 = vmax.f32 %v1094_v41, %v1095_v47 }
 0x142   :  { %v1033_v63 = vmul.f32 %v1001_v52, %v2062_v56  ;;  %v767_v0 = vadd.f32 %v1441_v53, %v2050_v37  ;;  %v1444_v1 = vadd.f32 %v1443_v61, %v1442_v57  ;;  %v1555_v2 = vpop.f32.mrb[39].mxu1  ;;  %v1100_v3 = vrot.slane %v1099_v51, 2 }
 0x143   :  { %v1556_v4 = vadd.f32 %v1555_v2, %v1554_v60  ;;  %v1170_v5 = vmul.f32 %v2078_v9, %v1096_v62 }
 0x144   :  { %v1104_v6 = vmax.f32 %v1032_v58, %v1033_v63  ;;  %v928_v7 = vadd.f32 %v1553_v59, %v767_v0  ;;  %v770_v8 = vadd.f32 %v1444_v1, %v2050_v37  ;;  %v1101_v10 = vmax.f32 %v1099_v51, %v1100_v3 }
 0x145   :  { %v1211_v11 = vrot.slane %v1170_v5, 2 }
 0x146   :  { %v1105_v12 = vrot.slane %v1104_v6, 4  ;;  %v1002_v13 = vmax.f32 %v928_v7, 0.0  ;;  %v931_v14 = vadd.f32 %v1556_v4, %v770_v8  ;;  %v1445_v15 = vpop.f32.mrb[40].mxu0  ;;  %v1102_v16 = vrot.slane %v1101_v10, 1 }
 0x147   :  { %v1557_v17 = vpop.f32.mrb[40].mxu1  ;;  %v1446_v18 = vpop.f32.mrb[41].mxu0  ;;  %v1213_v19 = vsel %vm1212_vm5, %v1211_v11, %v1210_v50 }
 0x148   :  { %v1106_v20 = vmax.f32 %v1104_v6, %v1105_v12  ;;  %v1003_v21 = vmax.f32 %v931_v14, 0.0  ;;  %v1447_v22 = vadd.f32 %v1446_v18, %v1445_v15  ;;  %v1558_v23 = vpop.f32.mrb[41].mxu1  ;;  %v1448_v24 = vpop.f32.mrb[42].mxu0  ;;  %v1103_v28 = vmax.f32 %v1101_v10, %v1102_v16 }
 0x149   :  { %v1559_v25 = vadd.f32 %v1558_v23, %v1557_v17  ;;  %v1560_v26 = vpop.f32.mrb[42].mxu1  ;;  %v1449_v27 = vpop.f32.mrb[43].mxu0  ;;  %v1034_v29 = vmul.f32 %v1002_v13, %v2057_v55 }
 0x14a   :  { %v1035_v30 = vmul.f32 %v1003_v21, %v2062_v56  ;;  %v775_v31 = vadd.f32 %v1447_v22, %v2050_v37  ;;  %v1450_v32 = vadd.f32 %v1449_v27, %v1448_v24  ;;  %v1561_v34 = vpop.f32.mrb[43].mxu1  ;;  %v1107_v36 = vrot.slane %v1106_v20, 2 }
 0x14b   :  { %v1562_v38 = vadd.f32 %v1561_v34, %v1560_v26  ;;  %v1171_v39 = vmul.f32 %v2078_v9, %v1103_v28 }
 0x14c   :  { %v1111_v40 = vmax.f32 %v1034_v29, %v1035_v30  ;;  %v936_v41 = vadd.f32 %v1559_v25, %v775_v31  ;;  %v778_v42 = vadd.f32 %v1450_v32, %v2050_v37  ;;  %v1108_v48 = vmax.f32 %v1106_v20, %v1107_v36 }
 0x14d   :  { %v1214_v43 = vrot.slane %v1171_v39, 1 }
 0x14e   :  { %v1112_v44 = vrot.slane %v1111_v40, 4  ;;  %v1004_v45 = vmax.f32 %v936_v41, 0.0  ;;  %v939_v46 = vadd.f32 %v1562_v38, %v778_v42  ;;  %v1451_v47 = vpop.f32.mrb[44].mxu0  ;;  %v1109_v3 = vrot.slane %v1108_v48, 1 }
 0x14f   :  { %v1563_v49 = vpop.f32.mrb[44].mxu1  ;;  %v1452_v50 = vpop.f32.mrb[45].mxu0  ;;  %v1216_v51 = vsel %vm1215_vm6, %v1214_v43, %v1213_v19 }
 0x150   :  { %v1113_v52 = vmax.f32 %v1111_v40, %v1112_v44  ;;  %v1005_v53 = vmax.f32 %v939_v46, 0.0  ;;  %v1564_v54 = vpop.f32.mrb[45].mxu1  ;;  %1233 = vadd.xlane.f32.xlu0 %v1216_v51  ;;  %v1454_v57 = vpop.f32.mrb[46].mxu0  ;;  %v1453_v58 = vadd.f32 %v1452_v50, %v1451_v47  ;;  %v1036_v63 = vmul.f32 %v1004_v45, %v2057_v55 }
 0x151   :  { %v1565_v59 = vadd.f32 %v1564_v54, %v1563_v49  ;;  %v1566_v60 = vpop.f32.mrb[46].mxu1  ;;  %v1455_v61 = vpop.f32.mrb[47].mxu0  ;;  %v1110_v15 = vmax.f32 %v1108_v48, %v1109_v3 }
 0x152   :  { %v1114_v62 = vrot.slane %v1113_v52, 2  ;;  %v1037_v0 = vmul.f32 %v1005_v53, %v2062_v56  ;;  %v1456_v1 = vadd.f32 %v1455_v61, %v1454_v57  ;;  %v1567_v2 = vpop.f32.mrb[47].mxu1  ;;  %v783_v4 = vadd.f32 %v1453_v58, %v2050_v37 }
 0x153   :  { %v1568_v5 = vadd.f32 %v1567_v2, %v1566_v60  ;;  %v1172_v36 = vmul.f32 %v2078_v9, %v1110_v15 }
 0x154   :  { %v1115_v6 = vmax.f32 %v1113_v52, %v1114_v62  ;;  %v1118_v7 = vmax.f32 %v1036_v63, %v1037_v0  ;;  %v786_v8 = vadd.f32 %v1456_v1, %v2050_v37  ;;  %v944_v10 = vadd.f32 %v1565_v59, %v783_v4 }
 0x156   :  { %v1116_v11 = vrot.slane %v1115_v6, 1  ;;  %v1119_v12 = vrot.slane %v1118_v7, 4  ;;  %v947_v13 = vadd.f32 %v1568_v5, %v786_v8  ;;  %v1457_v14 = vpop.f32.mrb[48].mxu0  ;;  %v1006_v16 = vmax.f32 %v944_v10, 0.0 }
 0x157   :  { %v1569_v17 = vpop.f32.mrb[48].mxu1  ;;  %v1458_v18 = vpop.f32.mrb[49].mxu0 }
 0x158   :  { %v1117_v19 = vmax.f32 %v1115_v6, %v1116_v11  ;;  %v1120_v20 = vmax.f32 %v1118_v7, %v1119_v12  ;;  %v1007_v21 = vmax.f32 %v947_v13, 0.0  ;;  %v1459_v22 = vadd.f32 %v1458_v18, %v1457_v14  ;;  %v1570_v23 = vpop.f32.mrb[49].mxu1  ;;  %v1460_v24 = vpop.f32.mrb[50].mxu0 }
 0x159   :  { %v1038_v25 = vmul.f32 %v1006_v16, %v2057_v55  ;;  %v1571_v26 = vadd.f32 %v1570_v23, %v1569_v17  ;;  %v1572_v27 = vpop.f32.mrb[50].mxu1  ;;  %v1461_v28 = vpop.f32.mrb[51].mxu0 }
 0x15a   :  { %v1173_v29 = vmul.f32 %v2078_v9, %v1117_v19  ;;  %v1121_v30 = vrot.slane %v1120_v20, 2  ;;  %v1039_v31 = vmul.f32 %v1007_v21, %v2062_v56  ;;  %v791_v32 = vadd.f32 %v1459_v22, %v2050_v37  ;;  %v1573_v34 = vpop.f32.mrb[51].mxu1 }
 0x15b   :  { %v1462_v38 = vadd.f32 %v1461_v28, %v1460_v24  ;;  %v1574_v39 = vadd.f32 %v1573_v34, %v1572_v27 }
 0x15c   :  { %v1217_v40 = vrot.slane %v1173_v29, 7  ;;  %v1122_v41 = vmax.f32 %v1120_v20, %v1121_v30  ;;  %v1125_v42 = vmax.f32 %v1038_v25, %v1039_v31  ;;  %v952_v43 = vadd.f32 %v1571_v26, %v791_v32 }
 0x15d   :  { %v794_v44 = vadd.f32 %v1462_v38, %v2050_v37 }
 0x15e   :  { %v1123_v45 = vrot.slane %v1122_v41, 1  ;;  %v1126_v46 = vrot.slane %v1125_v42, 4  ;;  %v1463_v47 = vpop.f32.mrb[52].mxu0  ;;  %v1218_v48 = vsel %vm1197_vm0, %v1217_v40, %v1172_v36  ;;  %v1008_v49 = vmax.f32 %v952_v43, 0.0 }
 0x15f   :  { %v955_v50 = vadd.f32 %v1574_v39, %v794_v44  ;;  %v1575_v51 = vpop.f32.mrb[52].mxu1  ;;  %v1464_v52 = vpop.f32.mrb[53].mxu0 }
 0x160   :  { %v1124_v53 = vmax.f32 %v1122_v41, %v1123_v45  ;;  %v1127_v54 = vmax.f32 %v1125_v42, %v1126_v46  ;;  %v1465_v57 = vadd.f32 %v1464_v52, %v1463_v47  ;;  %v1576_v58 = vpop.f32.mrb[53].mxu1  ;;  %v1466_v59 = vpop.f32.mrb[54].mxu0  ;;  %v1040_v5 = vmul.f32 %v1008_v49, %v2057_v55 }
 0x161   :  { %v1009_v60 = vmax.f32 %v955_v50, 0.0  ;;  %v1577_v61 = vadd.f32 %v1576_v58, %v1575_v51  ;;  %v1578_v62 = vpop.f32.mrb[54].mxu1  ;;  %v1467_v63 = vpop.f32.mrb[55].mxu0 }
 0x162   :  { %v1174_v0 = vmul.f32 %v2078_v9, %v1124_v53  ;;  %v1128_v1 = vrot.slane %v1127_v54, 2  ;;  %v799_v2 = vadd.f32 %v1465_v57, %v2050_v37  ;;  %v1468_v3 = vadd.f32 %v1467_v63, %v1466_v59  ;;  %v1579_v4 = vpop.f32.mrb[55].mxu1 }
 0x163   :  { %v1041_v6 = vmul.f32 %v1009_v60, %v2062_v56  ;;  %v1580_v7 = vadd.f32 %v1579_v4, %v1578_v62  ;;  %v1732_v62 = vmov 0  }
 0x164   :  { %v1219_v8 = vrot.slane %v1174_v0, 6  ;;  %v1129_v10 = vmax.f32 %v1127_v54, %v1128_v1  ;;  %v960_v11 = vadd.f32 %v1577_v61, %v799_v2  ;;  %v802_v12 = vadd.f32 %v1468_v3, %v2050_v37  ;;  %1594 = vset.pattern.permute.xlu1 %v1732_v62  ;;  %1595 = vset.pattern.permute.xlu0 %v1732_v62 }
 0x165   :  { %v1132_v13 = vmax.f32 %v1040_v5, %v1041_v6 }
 0x166   :  { %v1130_v14 = vrot.slane %v1129_v10, 1  ;;  %v1010_v15 = vmax.f32 %v960_v11, 0.0  ;;  %v963_v16 = vadd.f32 %v1580_v7, %v802_v12  ;;  %v1469_v17 = vpop.f32.mrb[56].mxu0  ;;  %v1220_v18 = vsel %vm1200_vm1, %v1219_v8, %v1218_v48 }
 0x167   :  { %v1133_v19 = vrot.slane %v1132_v13, 4  ;;  %v1581_v20 = vpop.f32.mrb[56].mxu1  ;;  %v1470_v21 = vpop.f32.mrb[57].mxu0 }
 0x168   :  { %v1131_v22 = vmax.f32 %v1129_v10, %v1130_v14  ;;  %v1011_v23 = vmax.f32 %v963_v16, 0.0  ;;  %v1471_v24 = vadd.f32 %v1470_v21, %v1469_v17  ;;  %v1582_v25 = vpop.f32.mrb[57].mxu1  ;;  %v1472_v26 = vpop.f32.mrb[58].mxu0  ;;  %v1042_v28 = vmul.f32 %v1010_v15, %v2057_v55 }
 0x169   :  { %v1134_v27 = vmax.f32 %v1132_v13, %v1133_v19  ;;  %v1583_v29 = vadd.f32 %v1582_v25, %v1581_v20  ;;  %v1584_v30 = vpop.f32.mrb[58].mxu1  ;;  %v1473_v31 = vpop.f32.mrb[59].mxu0 }
 0x16a   :  { %v1043_v32 = vmul.f32 %v1011_v23, %v2062_v56  ;;  %v807_v34 = vadd.f32 %v1471_v24, %v2050_v37  ;;  %v1474_v36 = vadd.f32 %v1473_v31, %v1472_v26  ;;  %v1585_v38 = vpop.f32.mrb[59].mxu1  ;;  %v1175_v39 = vmul.f32 %v2078_v9, %v1131_v22 }
 0x16b   :  { %v1135_v40 = vrot.slane %v1134_v27, 2  ;;  %v1586_v41 = vadd.f32 %v1585_v38, %v1584_v30 }
 0x16c   :  { %v1139_v42 = vmax.f32 %v1042_v28, %v1043_v32  ;;  %v968_v43 = vadd.f32 %v1583_v29, %v807_v34  ;;  %v810_v44 = vadd.f32 %v1474_v36, %v2050_v37  ;;  %v1221_v45 = vrot.slane %v1175_v39, 5 }
 0x16d   :  { %v1136_v46 = vmax.f32 %v1134_v27, %v1135_v40 }
 0x16e   :  { %v1140_v47 = vrot.slane %v1139_v42, 4  ;;  %v1012_v48 = vmax.f32 %v968_v43, 0.0  ;;  %v971_v49 = vadd.f32 %v1586_v41, %v810_v44  ;;  %v1475_v50 = vpop.f32.mrb[60].mxu0  ;;  %v1222_v51 = vsel %vm1203_vm2, %v1221_v45, %v1220_v18 }
 0x16f   :  { %v1137_v52 = vrot.slane %v1136_v46, 1  ;;  %v1587_v53 = vpop.f32.mrb[60].mxu1  ;;  %v1476_v54 = vpop.f32.mrb[61].mxu0 }
 0x170   :  { %v1141_v57 = vmax.f32 %v1139_v42, %v1140_v47  ;;  %v1013_v58 = vmax.f32 %v971_v49, 0.0  ;;  %v1477_v59 = vadd.f32 %v1476_v54, %v1475_v50  ;;  %v1588_v60 = vpop.f32.mrb[61].mxu1  ;;  %v1478_v61 = vpop.f32.mrb[62].mxu0  ;;  %v1044_v0 = vmul.f32 %v1012_v48, %v2057_v55 }
 0x171   :  { %v1138_v63 = vmax.f32 %v1136_v46, %v1137_v52  ;;  %v1589_v1 = vadd.f32 %v1588_v60, %v1587_v53  ;;  %v1590_v2 = vpop.f32.mrb[62].mxu1  ;;  %v1479_v3 = vpop.f32.mrb[63].mxu0  ;;  %v1239_v47 = vsub.s32 2, %v2041_v33 }
 0x172   :  { %v1142_v4 = vrot.slane %v1141_v57, 2  ;;  %v1045_v5 = vmul.f32 %v1013_v58, %v2062_v56  ;;  %v815_v6 = vadd.f32 %v1477_v59, %v2050_v37  ;;  %v1480_v7 = vadd.f32 %v1479_v3, %v1478_v61  ;;  %v1591_v8 = vpop.f32.mrb[63].mxu1 }
 0x173   :  { %v1592_v10 = vadd.f32 %v1591_v8, %v1590_v2  ;;  %v1176_v11 = vmul.f32 %v2078_v9, %v1138_v63  ;;  %v1240_v48 = vrot.slane %v2047_v35, %v1239_v47 }
 0x174   :  { %v1143_v12 = vmax.f32 %v1141_v57, %v1142_v4  ;;  %v1146_v13 = vmax.f32 %v1044_v0, %v1045_v5  ;;  %v976_v14 = vadd.f32 %v1589_v1, %v815_v6  ;;  %v818_v15 = vadd.f32 %v1480_v7, %v2050_v37 }
 0x175   :  { %v1223_v16 = vrot.slane %v1176_v11, 4 }
 0x176   :  { %v1144_v17 = vrot.slane %v1143_v12, 1  ;;  %v1147_v18 = vrot.slane %v1146_v13, 4  ;;  %v1014_v19 = vmax.f32 %v976_v14, 0.0  ;;  %v979_v20 = vadd.f32 %v1592_v10, %v818_v15 }
 0x177   :  { %v1224_v21 = vsel %vm1206_vm3, %v1223_v16, %v1222_v51 }
 0x178   :  { %v1148_v22 = vmax.f32 %v1146_v13, %v1147_v18  ;;  %v1015_v23 = vmax.f32 %v979_v20, 0.0  ;;  %v1145_v24 = vmax.f32 %v1143_v12, %v1144_v17  ;;  %v1046_v26 = vmul.f32 %v1014_v19, %v2057_v55 }
 0x17a   :  { %v1149_v25 = vrot.slane %v1148_v22, 2  ;;  %v1047_v27 = vmul.f32 %v1015_v23, %v2062_v56  ;;  %v1177_v28 = vmul.f32 %v2078_v9, %v1145_v24 }
 0x17c   :  { %v1150_v29 = vmax.f32 %v1148_v22, %v1149_v25  ;;  %v1153_v30 = vmax.f32 %v1046_v26, %v1047_v27  ;;  %v1225_v37 = vrot.slane %v1177_v28, 3 }
 0x17e   :  { %v1154_v31 = vrot.slane %v1153_v30, 4  ;;  %v1151_v32 = vrot.slane %v1150_v29, 1  ;;  %v1226_v34 = vsel %vm1209_vm4, %v1225_v37, %v1224_v21 }
 0x180   :  { %v1155_v36 = vmax.f32 %v1153_v30, %v1154_v31  ;;  %v1152_v38 = vmax.f32 %v1150_v29, %v1151_v32 }
 0x182   :  { %v1156_v39 = vrot.slane %v1155_v36, 2  ;;  %v1178_v40 = vmul.f32 %v2078_v9, %v1152_v38 }
 0x184   :  { %v1157_v41 = vmax.f32 %v1155_v36, %v1156_v39  ;;  %v1227_v42 = vrot.slane %v1178_v40, 2 }
 0x186   :  { %v1158_v43 = vrot.slane %v1157_v41, 1  ;;  %v1228_v55 = vsel %vm1212_vm5, %v1227_v42, %v1226_v34 }
 0x188   :  { %v1159_v56 = vmax.f32 %v1157_v41, %v1158_v43 }
 0x18a   :  { %v1179_v44 = vmul.f32 %v2078_v9, %v1159_v56 }
 0x18c   :  { %v1229_v45 = vrot.slane %v1179_v44, 1 }
 0x18e   :  { %v1230_v46 = vsel %vm1215_vm6, %v1229_v45, %v1228_v55 }
 0x18f   :  { %1235 = vadd.xlane.f32.xlu0 %v1230_v46 }
 0x1dd   :  { %v1234_v49 = vpop.xlane.xlu0 %1233 }
 0x1de   :  { %v1241_v50 = vadd.f32 %v1240_v48, %v1234_v49 }
 0x1e0   :  { %v1367_v51 = vmul.f32 -1.442695, %v1241_v50 }
 0x1e2   :  { %1724 = vpow2.f32 %v1367_v51 }
 0x1ec   :  { %v1725_v52 = vpop.eup %1724 }
 0x1ed   :  { %v1249_v53 = vadd.f32 1.0, %v1725_v52 }
 0x1ef   :  { %1726 = vrcp.f32 %v1249_v53 }
 0x1f9   :  { %v1727_v54 = vpop.eup %1726 }
 0x1fa   :  { %1257 = vperm.xlu1 %1594, %v1727_v54  }
 0x21c   :  { %v1236_v57 = vpop.xlane.xlu0 %1235 }
 0x21d   :  { %v1242_v58 = vadd.f32 %v1240_v48, %v1236_v57 }
 0x21f   :  { %v1368_v9 = vmul.f32 -1.442695, %v1242_v58 }
 0x221   :  { %1728 = vpow2.f32 %v1368_v9 }
 0x22b   :  { %v1729_v59 = vpop.eup %1728 }
 0x22c   :  { %v1250_v60 = vadd.f32 1.0, %v1729_v59 }
 0x22e   :  { %1730 = vrcp.f32 %v1250_v60 }
 0x238   :  { %v1731_v61 = vpop.eup %1730 }
 0x239   :  { %1262 = vperm.xlu1 %1594, %v1731_v61  }
 0x279   :  { %v1258_v33 = vpop.permute.xlu1 %1257 }
 0x27a   :  { %1265 = vst [vmem:[%s2171_s3] sm:$0xff] %v1258_v33 }
 0x2b8   :  { %v1263_v35 = vpop.permute.xlu1 %1262 }
 0x2b9   :  { %1266 = vst [vmem:[%s2171_s3 + $0x8] sm:$0xff] %v1263_v35 }

</bundles_post_ra>
